<compile_context>
chip_gen: v6e
topology: v6e:2x2x1
jax: 0.10.0
libtpu: 0.0.40
codegen_flags: <defaults>
</compile_context>

<pallas_src>
import functools
import math

import jax
import jax.numpy as jnp
from jax.experimental import pallas as pl
from jax.experimental.pallas import tpu as pltpu


def _mha_kernel(x_ref, mask_ref,
                wq_ref, bq_ref, wk_ref, bk_ref, wv_ref, bv_ref, wo_ref, bo_ref,
                out_ref, heads_ref, *, nh, d_k):
    # x_ref block: (B, L, D); weights: (D, D); biases: (1, D); mask: (B, L, 1)
    # heads_ref scratch: (B*L, D) in the MXU dtype.
    B, L, D = x_ref.shape
    mxu_dtype = wq_ref.dtype
    scale = 1.0 / math.sqrt(d_k)

    # Cast x to the MXU dtype on-chip (hides under the MXU; avoids the extra
    # HBM read+write+read a wrapper-side astype would cost).
    x2 = x_ref[...].reshape(B * L, D).astype(mxu_dtype)

    # Q/K/V projections as (B*L, D) x (D, D) matmuls, f32 accumulation.
    q = jnp.dot(x2, wq_ref[...], preferred_element_type=jnp.float32) + bq_ref[0]
    k = jnp.dot(x2, wk_ref[...], preferred_element_type=jnp.float32) + bk_ref[0]
    v = jnp.dot(x2, wv_ref[...], preferred_element_type=jnp.float32) + bv_ref[0]

    # Query-row masking applied ONCE to q (B*L*D elements) instead of nh
    # selects over (B, L, L) score tiles: a zeroed q row -> all-zero score
    # row -> the same uniform 1/L softmax as PyTorch's masked_fill(-1e9).
    # The 1/sqrt(d_k) scale is folded in here as well.  mask_ref is (B, L, 1)
    # with L on sublanes, so no lane->sublane relayout is needed.
    row_keep = (mask_ref[...] != 0.0).reshape(B * L, 1)
    q = jnp.where(row_keep, q * scale, 0.0)

    q = q.astype(mxu_dtype).reshape(B, L, D)
    k = k.astype(mxu_dtype).reshape(B, L, D)
    v = v.astype(mxu_dtype).reshape(B, L, D)

    # Batched matmuls; QK^T contracts d_k of both operands so no explicit
    # transpose of K is materialized.
    dn_qk = (((2,), (2,)), ((0,), (0,)))   # (B,L,dk) x (B,L,dk) -> (B,L,L)
    dn_pv = (((2,), (1,)), ((0,), (0,)))   # (B,L,L)  x (B,L,dk) -> (B,L,dk)

    # NOTE: head slices are lane slices at multiples of d_k; for production
    # shapes keep d_k (and D) multiples of 128 so MXU operands stay lane-full
    # and the output store stays unmasked (lane-dense).
    for h in range(nh):
        sl = slice(h * d_k, (h + 1) * d_k)
        qh, kh, vh = q[:, :, sl], k[:, :, sl], v[:, :, sl]

        scores = jax.lax.dot_general(
            qh, kh, dn_qk, preferred_element_type=jnp.float32)      # (B, L, L)

        # Hand-rolled softmax in f32; the divide becomes an EUP reciprocal.
        m = jnp.max(scores, axis=-1, keepdims=True)
        e = jnp.exp(scores - m)
        p = e * pl.reciprocal(jnp.sum(e, axis=-1, keepdims=True), approx=True)

        head = jax.lax.dot_general(
            p.astype(mxu_dtype), vh, dn_pv,
            preferred_element_type=jnp.float32)                     # (B, L, d_k)

        # "Concatenate" by storing the head at its lane offset in VMEM
        # scratch; no jnp.concatenate, no per-head small-K Wo matmul.
        heads_ref[:, sl] = head.reshape(B * L, d_k).astype(mxu_dtype)

    # Single full-contraction (B*L, D) x (D, D) output projection (K = D
    # keeps the MXU full instead of nh matmuls at K = d_k).
    out = jnp.dot(heads_ref[...], wo_ref[...],
                  preferred_element_type=jnp.float32) + bo_ref[0]
    out_ref[...] = out.reshape(B, L, D).astype(out_ref.dtype)


def prepare_params(params, *, use_bf16_mxu=True):
    """Convert weights to the MXU dtype ONCE at parameter-setup time (not per
    call): bf16 operands halve weight DMA bytes and hit the bf16 MXU peak on
    v6e/v7x (v5e also benefits).  Softmax/mask math stays f32 in the kernel,
    so there is no v5e bf16 VPU/EUP dependency.  Biases stay f32."""
    mxu_dtype = jnp.bfloat16 if use_bf16_mxu else jnp.float32
    out = {}
    for name in ("wq", "wk", "wv", "wo"):
        out[name] = params[name].astype(mxu_dtype)
    for name in ("bq", "bk", "bv", "bo"):
        out[name] = params[name].astype(jnp.float32)
    return out


def _auto_vmem_limit(batch_block, L, D, x_itemsize, mxu_itemsize):
    """Rough per-grid-step working set, doubled for pipelining headroom, then
    clamped to [32 MiB, 48 MiB]: the floor lifts v5e above its 16 MiB default
    scoped VMEM; the cap stays inside v7x's 64 MiB physical VMEM per core."""
    rows = batch_block * L
    est = (2 * rows * D * (x_itemsize + 4)      # x in + out, double-buffered
           + 8 * D * D * mxu_itemsize           # 4 weights, double-buffered
           + 4 * rows * D * 4                   # q/k/v (+ slack), f32
           + 2 * rows * L * 4                   # scores + exp, f32 (per head)
           + rows * D * mxu_itemsize)           # head-concat scratch
    return int(min(48 * 1024 * 1024, max(32 * 1024 * 1024, 2 * est)))


def multi_headed_attention(x, mask, params, *, nh, batch_block=1,
                           vmem_limit_bytes="auto"):
    """x: (N, L, D), mask: (N, L) (1 = keep, 0 = masked query row),
    params: dict wq/bq/wk/bk/wv/bv/wo/bo in "x @ W + b" orientation, ideally
    pre-converted via prepare_params() so no per-call casts run.

    Pick batch_block so the grid stays >= 2 (ideally even): grid=1 forfeits
    all DMA/compute overlap and leaves one of v7x's two TensorCores idle."""
    N, L, D = x.shape
    assert D % nh == 0
    d_k = D // nh
    assert N % batch_block == 0
    grid_n = N // batch_block

    mxu_dtype = params["wq"].dtype

    # Mask laid out as (N, L, 1): L on sublanes -> used directly in the kernel.
    mask3 = mask.reshape(N, L, 1).astype(jnp.float32)

    if vmem_limit_bytes == "auto":
        vmem_limit_bytes = _auto_vmem_limit(
            batch_block, L, D,
            jnp.dtype(x.dtype).itemsize, jnp.dtype(mxu_dtype).itemsize)

    w_spec = pl.BlockSpec((D, D), lambda i: (0, 0))
    b_spec = pl.BlockSpec((1, D), lambda i: (0, 0))

    kernel = functools.partial(_mha_kernel, nh=nh, d_k=d_k)

    return pl.pallas_call(
        kernel,
        out_shape=jax.ShapeDtypeStruct((N, L, D), x.dtype),
        grid_spec=pltpu.PrefetchScalarGridSpec(
            num_scalar_prefetch=0,
            grid=(grid_n,),
            in_specs=[
                pl.BlockSpec((batch_block, L, D), lambda i: (i, 0, 0)),   # x
                pl.BlockSpec((batch_block, L, 1), lambda i: (i, 0, 0)),   # mask
                w_spec, b_spec,                                           # Wq, bq
                w_spec, b_spec,                                           # Wk, bk
                w_spec, b_spec,                                           # Wv, bv
                w_spec, b_spec,                                           # Wo, bo
            ],
            out_specs=pl.BlockSpec((batch_block, L, D), lambda i: (i, 0, 0)),
            scratch_shapes=[
                # head-concat buffer, MXU dtype, persistent across grid steps
                pltpu.VMEM((batch_block * L, D), mxu_dtype),
            ],
        ),
        compiler_params=pltpu.CompilerParams(
            dimension_semantics=("parallel",),
            vmem_limit_bytes=vmem_limit_bytes),
    )(x, mask3,
      params["wq"], params["bq"], params["wk"], params["bk"],
      params["wv"], params["bv"], params["wo"], params["bo"])


def _reference(x, mask, params, *, nh):
    """Pure-JAX f32 reference mirroring the PyTorch forward (eval mode)."""
    N, L, D = x.shape
    d_k = D // nh

    def lin(t, w, b):
        return t @ w + b[0]

    q = lin(x, params["wq"], params["bq"]).reshape(N, L, nh, d_k).transpose(0, 2, 1, 3)
    k = lin(x, params["wk"], params["bk"]).reshape(N, L, nh, d_k).transpose(0, 2, 1, 3)
    v = lin(x, params["wv"], params["bv"]).reshape(N, L, nh, d_k).transpose(0, 2, 1, 3)

    scores = jnp.einsum("nhqd,nhkd->nhqk", q, k) / math.sqrt(d_k)
    m = mask.reshape(N, 1, L, 1)
    scores = jnp.where(m == 0, -1000000000.0, scores)
    p = jax.nn.softmax(scores, axis=-1)
    o = jnp.einsum("nhqk,nhkd->nhqd", p, v)
    o = o.transpose(0, 2, 1, 3).reshape(N, L, D)
    return lin(o, params["wo"], params["bo"])


if __name__ == "__main__":
    # Small shapes consistent with the module: x (N, L, D), mask (N, L).
    # N=4 so both batch_block=1 (grid=4) and batch_block=2 (grid=2) keep the
    # grid >= 2 (megacore / pipelining friendly).
    N, L, D, nh = 4, 8, 32, 4

    key = jax.random.PRNGKey(0)
    keys = jax.random.split(key, 10)

    def init_linear(kw, kb, d):
        # deterministic, roughly PyTorch-uniform-scaled init
        bound = 1.0 / math.sqrt(d)
        w = jax.random.uniform(kw, (d, d), jnp.float32, -bound, bound)
        b = jax.random.uniform(kb, (1, d), jnp.float32, -bound, bound)
        return w, b

    wq, bq = init_linear(keys[0], keys[1], D)
    wk, bk = init_linear(keys[2], keys[3], D)
    wv, bv = init_linear(keys[4], keys[5], D)
    wo, bo = init_linear(keys[6], keys[7], D)
    params = dict(wq=wq, bq=bq, wk=wk, bk=bk, wv=wv, bv=bv, wo=wo, bo=bo)

    x = jax.random.normal(keys[8], (N, L, D), jnp.float32)
    # mask: 1 = keep, 0 = masked query row; make a few positions masked
    mask = (jax.random.uniform(keys[9], (N, L)) > 0.2).astype(jnp.float32)

    ref = _reference(x, mask, params, nh=nh)

    # f32 MXU operands, one batch element per grid step (grid = 4).
    p_f32 = prepare_params(params, use_bf16_mxu=False)
    out_f32 = jax.block_until_ready(
        multi_headed_attention(x, mask, p_f32, nh=nh, batch_block=1))
    assert out_f32.shape == (N, L, D)
    assert jnp.allclose(out_f32, ref, atol=5e-3, rtol=5e-3), "f32 path mismatch"

    # Default bf16 MXU operands (weights converted once at setup), two batch
    # elements per block so the grid stays at 2 -- looser tolerance for bf16
    # rounding of the matmul inputs.
    p_bf16 = prepare_params(params, use_bf16_mxu=True)
    out_bf16 = jax.block_until_ready(
        multi_headed_attention(x, mask, p_bf16, nh=nh, batch_block=2))
    assert jnp.allclose(out_bf16, ref, atol=1e-1, rtol=1e-1), "bf16 path mismatch"

    print("KERNEL_OK")
</pallas_src>

<mosaic_0001>
module attributes {stable_mosaic.version = 11 : i64} {
  func.func @_mha_kernel(%arg0: i32, %arg1: memref<1x8x32xf32, #tpu.memory_space<vmem>>, %arg2: memref<1x8x1xf32, #tpu.memory_space<vmem>>, %arg3: memref<32x32xf32, #tpu.memory_space<vmem>>, %arg4: memref<1x32xf32, #tpu.memory_space<vmem>>, %arg5: memref<32x32xf32, #tpu.memory_space<vmem>>, %arg6: memref<1x32xf32, #tpu.memory_space<vmem>>, %arg7: memref<32x32xf32, #tpu.memory_space<vmem>>, %arg8: memref<1x32xf32, #tpu.memory_space<vmem>>, %arg9: memref<32x32xf32, #tpu.memory_space<vmem>>, %arg10: memref<1x32xf32, #tpu.memory_space<vmem>>, %arg11: memref<1x8x32xf32, #tpu.memory_space<vmem>>, %arg12: memref<8x32xf32, #tpu.memory_space<vmem>>) attributes {dimension_semantics = [#tpu.dimension_semantics<parallel>], iteration_bounds = array<i64: 4>, scalar_prefetch = 0 : i64, scratch_operands = 1 : i64, tpu.core_type = #tpu.core_type<tc>, window_params = [{transform_indices = @transform_0, window_bounds = array<i64: 1, 8, 32>}, {transform_indices = @transform_1, window_bounds = array<i64: 1, 8, 1>}, {pipeline_mode = #tpu.pipeline_mode<synchronous>, transform_indices = @transform_2, window_bounds = array<i64: 32, 32>}, {pipeline_mode = #tpu.pipeline_mode<synchronous>, transform_indices = @transform_3, window_bounds = array<i64: 1, 32>}, {pipeline_mode = #tpu.pipeline_mode<synchronous>, transform_indices = @transform_4, window_bounds = array<i64: 32, 32>}, {pipeline_mode = #tpu.pipeline_mode<synchronous>, transform_indices = @transform_5, window_bounds = array<i64: 1, 32>}, {pipeline_mode = #tpu.pipeline_mode<synchronous>, transform_indices = @transform_6, window_bounds = array<i64: 32, 32>}, {pipeline_mode = #tpu.pipeline_mode<synchronous>, transform_indices = @transform_7, window_bounds = array<i64: 1, 32>}, {pipeline_mode = #tpu.pipeline_mode<synchronous>, transform_indices = @transform_8, window_bounds = array<i64: 32, 32>}, {pipeline_mode = #tpu.pipeline_mode<synchronous>, transform_indices = @transform_9, window_bounds = array<i64: 1, 32>}, {transform_indices = @transform_10, window_bounds = array<i64: 1, 8, 32>}]} {
    %c0 = arith.constant 0 : index
    %c0_0 = arith.constant 0 : index
    %c0_1 = arith.constant 0 : index
    %0 = vector.load %arg1[%c0, %c0_0, %c0_1] : memref<1x8x32xf32, #tpu.memory_space<vmem>>, vector<1x8x32xf32>
    %1 = vector.shape_cast %0 : vector<1x8x32xf32> to vector<8x32xf32>
    %c0_2 = arith.constant 0 : index
    %c0_3 = arith.constant 0 : index
    %2 = vector.load %arg3[%c0_2, %c0_3] : memref<32x32xf32, #tpu.memory_space<vmem>>, vector<32x32xf32>
    %cst = arith.constant dense<0.000000e+00> : vector<8x32xf32>
    %3 = tpu.matmul %1, %2, %cst {dimension_numbers = #tpu.dot_dimension_numbers<[1], [0], [0], [1], [0, 0, 1, 1], [], []>} : vector<8x32xf32>, vector<32x32xf32>, vector<8x32xf32> -> vector<8x32xf32>
    %c0_4 = arith.constant 0 : index
    %c0_5 = arith.constant 0 : index
    %4 = vector.load %arg4[%c0_4, %c0_5] : memref<1x32xf32, #tpu.memory_space<vmem>>, vector<1x32xf32>
    %5 = vector.shape_cast %4 : vector<1x32xf32> to vector<32xf32>
    %6 = vector.shape_cast %5 : vector<32xf32> to vector<1x32xf32>
    %7 = vector.broadcast %6 : vector<1x32xf32> to vector<8x32xf32>
    %8 = arith.addf %3, %7 : vector<8x32xf32>
    %c0_6 = arith.constant 0 : index
    %c0_7 = arith.constant 0 : index
    %9 = vector.load %arg5[%c0_6, %c0_7] : memref<32x32xf32, #tpu.memory_space<vmem>>, vector<32x32xf32>
    %cst_8 = arith.constant dense<0.000000e+00> : vector<8x32xf32>
    %10 = tpu.matmul %1, %9, %cst_8 {dimension_numbers = #tpu.dot_dimension_numbers<[1], [0], [0], [1], [0, 0, 1, 1], [], []>} : vector<8x32xf32>, vector<32x32xf32>, vector<8x32xf32> -> vector<8x32xf32>
    %c0_9 = arith.constant 0 : index
    %c0_10 = arith.constant 0 : index
    %11 = vector.load %arg6[%c0_9, %c0_10] : memref<1x32xf32, #tpu.memory_space<vmem>>, vector<1x32xf32>
    %12 = vector.shape_cast %11 : vector<1x32xf32> to vector<32xf32>
    %13 = vector.shape_cast %12 : vector<32xf32> to vector<1x32xf32>
    %14 = vector.broadcast %13 : vector<1x32xf32> to vector<8x32xf32>
    %15 = arith.addf %10, %14 : vector<8x32xf32>
    %c0_11 = arith.constant 0 : index
    %c0_12 = arith.constant 0 : index
    %16 = vector.load %arg7[%c0_11, %c0_12] : memref<32x32xf32, #tpu.memory_space<vmem>>, vector<32x32xf32>
    %cst_13 = arith.constant dense<0.000000e+00> : vector<8x32xf32>
    %17 = tpu.matmul %1, %16, %cst_13 {dimension_numbers = #tpu.dot_dimension_numbers<[1], [0], [0], [1], [0, 0, 1, 1], [], []>} : vector<8x32xf32>, vector<32x32xf32>, vector<8x32xf32> -> vector<8x32xf32>
    %c0_14 = arith.constant 0 : index
    %c0_15 = arith.constant 0 : index
    %18 = vector.load %arg8[%c0_14, %c0_15] : memref<1x32xf32, #tpu.memory_space<vmem>>, vector<1x32xf32>
    %19 = vector.shape_cast %18 : vector<1x32xf32> to vector<32xf32>
    %20 = vector.shape_cast %19 : vector<32xf32> to vector<1x32xf32>
    %21 = vector.broadcast %20 : vector<1x32xf32> to vector<8x32xf32>
    %22 = arith.addf %17, %21 : vector<8x32xf32>
    %c0_16 = arith.constant 0 : index
    %c0_17 = arith.constant 0 : index
    %c0_18 = arith.constant 0 : index
    %23 = vector.load %arg2[%c0_16, %c0_17, %c0_18] : memref<1x8x1xf32, #tpu.memory_space<vmem>>, vector<1x8x1xf32>
    %cst_19 = arith.constant 0.000000e+00 : f32
    %24 = vector.broadcast %cst_19 : f32 to vector<1x8x1xf32>
    %25 = arith.cmpf one, %23, %24 : vector<1x8x1xf32>
    %26 = vector.shape_cast %25 : vector<1x8x1xi1> to vector<8x1xi1>
    %cst_20 = arith.constant 0.353553385 : f32
    %27 = vector.broadcast %cst_20 : f32 to vector<8x32xf32>
    %28 = arith.mulf %8, %27 : vector<8x32xf32>
    %cst_21 = arith.constant 0.000000e+00 : f32
    %29 = vector.shape_cast %26 : vector<8x1xi1> to vector<8x1xi1>
    %30 = vector.broadcast %29 : vector<8x1xi1> to vector<8x32xi1>
    %31 = vector.broadcast %cst_21 : f32 to vector<8x32xf32>
    %32 = arith.select %30, %28, %31 : vector<8x32xi1>, vector<8x32xf32>
    %33 = vector.shape_cast %32 : vector<8x32xf32> to vector<1x8x32xf32>
    %34 = vector.shape_cast %15 : vector<8x32xf32> to vector<1x8x32xf32>
    %35 = vector.shape_cast %22 : vector<8x32xf32> to vector<1x8x32xf32>
    %36 = vector.extract_strided_slice %33 {offsets = [0, 0, 0], sizes = [1, 8, 8], strides = [1, 1, 1]} : vector<1x8x32xf32> to vector<1x8x8xf32>
    %37 = vector.extract_strided_slice %34 {offsets = [0, 0, 0], sizes = [1, 8, 8], strides = [1, 1, 1]} : vector<1x8x32xf32> to vector<1x8x8xf32>
    %38 = vector.extract_strided_slice %35 {offsets = [0, 0, 0], sizes = [1, 8, 8], strides = [1, 1, 1]} : vector<1x8x32xf32> to vector<1x8x8xf32>
    %cst_22 = arith.constant dense<0.000000e+00> : vector<1x8x8xf32>
    %39 = tpu.matmul %36, %37, %cst_22 {dimension_numbers = #tpu.dot_dimension_numbers<[2], [2], [1], [1], [0, 0, 0, 1, 1, 1], [0], [0]>} : vector<1x8x8xf32>, vector<1x8x8xf32>, vector<1x8x8xf32> -> vector<1x8x8xf32>
    %cst_23 = arith.constant dense<0xFF800000> : vector<1x8xf32>
    %40 = vector.multi_reduction <maximumf>, %39, %cst_23 [2] : vector<1x8x8xf32> to vector<1x8xf32>
    %41 = vector.shape_cast %40 : vector<1x8xf32> to vector<1x8x1xf32>
    %42 = vector.broadcast %41 : vector<1x8x1xf32> to vector<1x8x8xf32>
    %43 = arith.subf %39, %42 : vector<1x8x8xf32>
    %44 = math.exp %43 : vector<1x8x8xf32>
    %cst_24 = arith.constant dense<0.000000e+00> : vector<1x8xf32>
    %45 = vector.multi_reduction <add>, %44, %cst_24 [2] : vector<1x8x8xf32> to vector<1x8xf32>
    %46 = vector.shape_cast %45 : vector<1x8xf32> to vector<1x8x1xf32>
    %47 = tpu.reciprocal %46 {approx = true} : vector<1x8x1xf32> -> vector<1x8x1xf32>
    %48 = vector.broadcast %47 : vector<1x8x1xf32> to vector<1x8x8xf32>
    %49 = arith.mulf %44, %48 : vector<1x8x8xf32>
    %cst_25 = arith.constant dense<0.000000e+00> : vector<1x8x8xf32>
    %50 = tpu.matmul %49, %38, %cst_25 {dimension_numbers = #tpu.dot_dimension_numbers<[2], [1], [1], [2], [0, 0, 0, 1, 1, 2], [0], [0]>} : vector<1x8x8xf32>, vector<1x8x8xf32>, vector<1x8x8xf32> -> vector<1x8x8xf32>
    %51 = vector.shape_cast %50 : vector<1x8x8xf32> to vector<8x8xf32>
    %c0_26 = arith.constant 0 : index
    %c0_27 = arith.constant 0 : index
    %52 = vector.load %arg12[%c0_26, %c0_27] : memref<8x32xf32, #tpu.memory_space<vmem>>, vector<8x8xf32>
    tpu.vector_store %arg12[%c0_26, %c0_27], %51 {strides = array<i32>} : memref<8x32xf32, #tpu.memory_space<vmem>>, vector<8x8xf32>,
    %53 = vector.extract_strided_slice %33 {offsets = [0, 0, 8], sizes = [1, 8, 8], strides = [1, 1, 1]} : vector<1x8x32xf32> to vector<1x8x8xf32>
    %54 = vector.extract_strided_slice %34 {offsets = [0, 0, 8], sizes = [1, 8, 8], strides = [1, 1, 1]} : vector<1x8x32xf32> to vector<1x8x8xf32>
    %55 = vector.extract_strided_slice %35 {offsets = [0, 0, 8], sizes = [1, 8, 8], strides = [1, 1, 1]} : vector<1x8x32xf32> to vector<1x8x8xf32>
    %cst_28 = arith.constant dense<0.000000e+00> : vector<1x8x8xf32>
    %56 = tpu.matmul %53, %54, %cst_28 {dimension_numbers = #tpu.dot_dimension_numbers<[2], [2], [1], [1], [0, 0, 0, 1, 1, 1], [0], [0]>} : vector<1x8x8xf32>, vector<1x8x8xf32>, vector<1x8x8xf32> -> vector<1x8x8xf32>
    %cst_29 = arith.constant dense<0xFF800000> : vector<1x8xf32>
    %57 = vector.multi_reduction <maximumf>, %56, %cst_29 [2] : vector<1x8x8xf32> to vector<1x8xf32>
    %58 = vector.shape_cast %57 : vector<1x8xf32> to vector<1x8x1xf32>
    %59 = vector.broadcast %58 : vector<1x8x1xf32> to vector<1x8x8xf32>
    %60 = arith.subf %56, %59 : vector<1x8x8xf32>
    %61 = math.exp %60 : vector<1x8x8xf32>
    %cst_30 = arith.constant dense<0.000000e+00> : vector<1x8xf32>
    %62 = vector.multi_reduction <add>, %61, %cst_30 [2] : vector<1x8x8xf32> to vector<1x8xf32>
    %63 = vector.shape_cast %62 : vector<1x8xf32> to vector<1x8x1xf32>
    %64 = tpu.reciprocal %63 {approx = true} : vector<1x8x1xf32> -> vector<1x8x1xf32>
    %65 = vector.broadcast %64 : vector<1x8x1xf32> to vector<1x8x8xf32>
    %66 = arith.mulf %61, %65 : vector<1x8x8xf32>
    %cst_31 = arith.constant dense<0.000000e+00> : vector<1x8x8xf32>
    %67 = tpu.matmul %66, %55, %cst_31 {dimension_numbers = #tpu.dot_dimension_numbers<[2], [1], [1], [2], [0, 0, 0, 1, 1, 2], [0], [0]>} : vector<1x8x8xf32>, vector<1x8x8xf32>, vector<1x8x8xf32> -> vector<1x8x8xf32>
    %68 = vector.shape_cast %67 : vector<1x8x8xf32> to vector<8x8xf32>
    %c0_32 = arith.constant 0 : index
    %c8 = arith.constant 8 : index
    %69 = vector.load %arg12[%c0_32, %c8] : memref<8x32xf32, #tpu.memory_space<vmem>>, vector<8x8xf32>
    tpu.vector_store %arg12[%c0_32, %c8], %68 {strides = array<i32>} : memref<8x32xf32, #tpu.memory_space<vmem>>, vector<8x8xf32>,
    %70 = vector.extract_strided_slice %33 {offsets = [0, 0, 16], sizes = [1, 8, 8], strides = [1, 1, 1]} : vector<1x8x32xf32> to vector<1x8x8xf32>
    %71 = vector.extract_strided_slice %34 {offsets = [0, 0, 16], sizes = [1, 8, 8], strides = [1, 1, 1]} : vector<1x8x32xf32> to vector<1x8x8xf32>
    %72 = vector.extract_strided_slice %35 {offsets = [0, 0, 16], sizes = [1, 8, 8], strides = [1, 1, 1]} : vector<1x8x32xf32> to vector<1x8x8xf32>
    %cst_33 = arith.constant dense<0.000000e+00> : vector<1x8x8xf32>
    %73 = tpu.matmul %70, %71, %cst_33 {dimension_numbers = #tpu.dot_dimension_numbers<[2], [2], [1], [1], [0, 0, 0, 1, 1, 1], [0], [0]>} : vector<1x8x8xf32>, vector<1x8x8xf32>, vector<1x8x8xf32> -> vector<1x8x8xf32>
    %cst_34 = arith.constant dense<0xFF800000> : vector<1x8xf32>
    %74 = vector.multi_reduction <maximumf>, %73, %cst_34 [2] : vector<1x8x8xf32> to vector<1x8xf32>
    %75 = vector.shape_cast %74 : vector<1x8xf32> to vector<1x8x1xf32>
    %76 = vector.broadcast %75 : vector<1x8x1xf32> to vector<1x8x8xf32>
    %77 = arith.subf %73, %76 : vector<1x8x8xf32>
    %78 = math.exp %77 : vector<1x8x8xf32>
    %cst_35 = arith.constant dense<0.000000e+00> : vector<1x8xf32>
    %79 = vector.multi_reduction <add>, %78, %cst_35 [2] : vector<1x8x8xf32> to vector<1x8xf32>
    %80 = vector.shape_cast %79 : vector<1x8xf32> to vector<1x8x1xf32>
    %81 = tpu.reciprocal %80 {approx = true} : vector<1x8x1xf32> -> vector<1x8x1xf32>
    %82 = vector.broadcast %81 : vector<1x8x1xf32> to vector<1x8x8xf32>
    %83 = arith.mulf %78, %82 : vector<1x8x8xf32>
    %cst_36 = arith.constant dense<0.000000e+00> : vector<1x8x8xf32>
    %84 = tpu.matmul %83, %72, %cst_36 {dimension_numbers = #tpu.dot_dimension_numbers<[2], [1], [1], [2], [0, 0, 0, 1, 1, 2], [0], [0]>} : vector<1x8x8xf32>, vector<1x8x8xf32>, vector<1x8x8xf32> -> vector<1x8x8xf32>
    %85 = vector.shape_cast %84 : vector<1x8x8xf32> to vector<8x8xf32>
    %c0_37 = arith.constant 0 : index
    %c16 = arith.constant 16 : index
    %86 = vector.load %arg12[%c0_37, %c16] : memref<8x32xf32, #tpu.memory_space<vmem>>, vector<8x8xf32>
    tpu.vector_store %arg12[%c0_37, %c16], %85 {strides = array<i32>} : memref<8x32xf32, #tpu.memory_space<vmem>>, vector<8x8xf32>,
    %87 = vector.extract_strided_slice %33 {offsets = [0, 0, 24], sizes = [1, 8, 8], strides = [1, 1, 1]} : vector<1x8x32xf32> to vector<1x8x8xf32>
    %88 = vector.extract_strided_slice %34 {offsets = [0, 0, 24], sizes = [1, 8, 8], strides = [1, 1, 1]} : vector<1x8x32xf32> to vector<1x8x8xf32>
    %89 = vector.extract_strided_slice %35 {offsets = [0, 0, 24], sizes = [1, 8, 8], strides = [1, 1, 1]} : vector<1x8x32xf32> to vector<1x8x8xf32>
    %cst_38 = arith.constant dense<0.000000e+00> : vector<1x8x8xf32>
    %90 = tpu.matmul %87, %88, %cst_38 {dimension_numbers = #tpu.dot_dimension_numbers<[2], [2], [1], [1], [0, 0, 0, 1, 1, 1], [0], [0]>} : vector<1x8x8xf32>, vector<1x8x8xf32>, vector<1x8x8xf32> -> vector<1x8x8xf32>
    %cst_39 = arith.constant dense<0xFF800000> : vector<1x8xf32>
    %91 = vector.multi_reduction <maximumf>, %90, %cst_39 [2] : vector<1x8x8xf32> to vector<1x8xf32>
    %92 = vector.shape_cast %91 : vector<1x8xf32> to vector<1x8x1xf32>
    %93 = vector.broadcast %92 : vector<1x8x1xf32> to vector<1x8x8xf32>
    %94 = arith.subf %90, %93 : vector<1x8x8xf32>
    %95 = math.exp %94 : vector<1x8x8xf32>
    %cst_40 = arith.constant dense<0.000000e+00> : vector<1x8xf32>
    %96 = vector.multi_reduction <add>, %95, %cst_40 [2] : vector<1x8x8xf32> to vector<1x8xf32>
    %97 = vector.shape_cast %96 : vector<1x8xf32> to vector<1x8x1xf32>
    %98 = tpu.reciprocal %97 {approx = true} : vector<1x8x1xf32> -> vector<1x8x1xf32>
    %99 = vector.broadcast %98 : vector<1x8x1xf32> to vector<1x8x8xf32>
    %100 = arith.mulf %95, %99 : vector<1x8x8xf32>
    %cst_41 = arith.constant dense<0.000000e+00> : vector<1x8x8xf32>
    %101 = tpu.matmul %100, %89, %cst_41 {dimension_numbers = #tpu.dot_dimension_numbers<[2], [1], [1], [2], [0, 0, 0, 1, 1, 2], [0], [0]>} : vector<1x8x8xf32>, vector<1x8x8xf32>, vector<1x8x8xf32> -> vector<1x8x8xf32>
    %102 = vector.shape_cast %101 : vector<1x8x8xf32> to vector<8x8xf32>
    %c0_42 = arith.constant 0 : index
    %c24 = arith.constant 24 : index
    %103 = vector.load %arg12[%c0_42, %c24] : memref<8x32xf32, #tpu.memory_space<vmem>>, vector<8x8xf32>
    tpu.vector_store %arg12[%c0_42, %c24], %102 {strides = array<i32>} : memref<8x32xf32, #tpu.memory_space<vmem>>, vector<8x8xf32>,
    %c0_43 = arith.constant 0 : index
    %c0_44 = arith.constant 0 : index
    %104 = vector.load %arg12[%c0_43, %c0_44] : memref<8x32xf32, #tpu.memory_space<vmem>>, vector<8x32xf32>
    %c0_45 = arith.constant 0 : index
    %c0_46 = arith.constant 0 : index
    %105 = vector.load %arg9[%c0_45, %c0_46] : memref<32x32xf32, #tpu.memory_space<vmem>>, vector<32x32xf32>
    %cst_47 = arith.constant dense<0.000000e+00> : vector<8x32xf32>
    %106 = tpu.matmul %104, %105, %cst_47 {dimension_numbers = #tpu.dot_dimension_numbers<[1], [0], [0], [1], [0, 0, 1, 1], [], []>} : vector<8x32xf32>, vector<32x32xf32>, vector<8x32xf32> -> vector<8x32xf32>
    %c0_48 = arith.constant 0 : index
    %c0_49 = arith.constant 0 : index
    %107 = vector.load %arg10[%c0_48, %c0_49] : memref<1x32xf32, #tpu.memory_space<vmem>>, vector<1x32xf32>
    %108 = vector.shape_cast %107 : vector<1x32xf32> to vector<32xf32>
    %109 = vector.shape_cast %108 : vector<32xf32> to vector<1x32xf32>
    %110 = vector.broadcast %109 : vector<1x32xf32> to vector<8x32xf32>
    %111 = arith.addf %106, %110 : vector<8x32xf32>
    %112 = vector.shape_cast %111 : vector<8x32xf32> to vector<1x8x32xf32>
    %c0_50 = arith.constant 0 : index
    %c0_51 = arith.constant 0 : index
    %c0_52 = arith.constant 0 : index
    %113 = vector.load %arg11[%c0_50, %c0_51, %c0_52] : memref<1x8x32xf32, #tpu.memory_space<vmem>>, vector<1x8x32xf32>
    tpu.vector_store %arg11[%c0_50, %c0_51, %c0_52], %112 {strides = array<i32>} : memref<1x8x32xf32, #tpu.memory_space<vmem>>, vector<1x8x32xf32>,
    return
  }
  func.func @transform_0(%arg0: i32) -> (i32, i32, i32) {
    %c0_i32 = arith.constant 0 : i32
    %c0_i32_0 = arith.constant 0 : i32
    %c0_i32_1 = arith.constant 0 : i32
    return %arg0, %c0_i32, %c0_i32_0 : i32, i32, i32
  }
  func.func @transform_1(%arg0: i32) -> (i32, i32, i32) {
    %c0_i32 = arith.constant 0 : i32
    %c0_i32_0 = arith.constant 0 : i32
    %c0_i32_1 = arith.constant 0 : i32
    return %arg0, %c0_i32, %c0_i32_0 : i32, i32, i32
  }
  func.func @transform_2(%arg0: i32) -> (i32, i32) {
    %c0_i32 = arith.constant 0 : i32
    %c0_i32_0 = arith.constant 0 : i32
    %c0_i32_1 = arith.constant 0 : i32
    return %c0_i32, %c0_i32_0 : i32, i32
  }
  func.func @transform_3(%arg0: i32) -> (i32, i32) {
    %c0_i32 = arith.constant 0 : i32
    %c0_i32_0 = arith.constant 0 : i32
    %c0_i32_1 = arith.constant 0 : i32
    return %c0_i32, %c0_i32_0 : i32, i32
  }
  func.func @transform_4(%arg0: i32) -> (i32, i32) {
    %c0_i32 = arith.constant 0 : i32
    %c0_i32_0 = arith.constant 0 : i32
    %c0_i32_1 = arith.constant 0 : i32
    return %c0_i32, %c0_i32_0 : i32, i32
  }
  func.func @transform_5(%arg0: i32) -> (i32, i32) {
    %c0_i32 = arith.constant 0 : i32
    %c0_i32_0 = arith.constant 0 : i32
    %c0_i32_1 = arith.constant 0 : i32
    return %c0_i32, %c0_i32_0 : i32, i32
  }
  func.func @transform_6(%arg0: i32) -> (i32, i32) {
    %c0_i32 = arith.constant 0 : i32
    %c0_i32_0 = arith.constant 0 : i32
    %c0_i32_1 = arith.constant 0 : i32
    return %c0_i32, %c0_i32_0 : i32, i32
  }
  func.func @transform_7(%arg0: i32) -> (i32, i32) {
    %c0_i32 = arith.constant 0 : i32
    %c0_i32_0 = arith.constant 0 : i32
    %c0_i32_1 = arith.constant 0 : i32
    return %c0_i32, %c0_i32_0 : i32, i32
  }
  func.func @transform_8(%arg0: i32) -> (i32, i32) {
    %c0_i32 = arith.constant 0 : i32
    %c0_i32_0 = arith.constant 0 : i32
    %c0_i32_1 = arith.constant 0 : i32
    return %c0_i32, %c0_i32_0 : i32, i32
  }
  func.func @transform_9(%arg0: i32) -> (i32, i32) {
    %c0_i32 = arith.constant 0 : i32
    %c0_i32_0 = arith.constant 0 : i32
    %c0_i32_1 = arith.constant 0 : i32
    return %c0_i32, %c0_i32_0 : i32, i32
  }
  func.func @transform_10(%arg0: i32) -> (i32, i32, i32) {
    %c0_i32 = arith.constant 0 : i32
    %c0_i32_0 = arith.constant 0 : i32
    %c0_i32_1 = arith.constant 0 : i32
    return %arg0, %c0_i32, %c0_i32_0 : i32, i32, i32
  }
}

</mosaic_0001>

<bundles_post_ra>
// kernel: tpu_custom_call.1
= control target key start
LH: loop header
LB: loop body
LE: loop exit
PB: predicated region body
PF: predicated region fallthrough
CT: control target
= control target key end

     0   :  { %15 = vsyncpa [#allocation4], 0  ;;  %s2362_s0 = inlined_call_operand.vmem [shape: f32[4,8,32], index: 0, kind: input, shape index: {}]   ;;  %s2363_s1 = inlined_call_operand.vmem [shape: f32[4,8,1], index: 1, kind: input, shape index: {}]   ;;  %s2364_s2 = inlined_call_operand.hbm [shape: f32[32,32], index: 2, kind: input, shape index: {}]   ;;  %s2365_s3 = inlined_call_operand.vmem [shape: f32[1,32], index: 3, kind: input, shape index: {}]   ;;  %s2366_s4 = inlined_call_operand.hbm [shape: f32[32,32], index: 4, kind: input, shape index: {}]   ;;  %s2367_s5 = inlined_call_operand.vmem [shape: f32[1,32], index: 5, kind: input, shape index: {}]   ;;  %s2368_s6 = inlined_call_operand.hbm [shape: f32[32,32], index: 6, kind: input, shape index: {}]   ;;  %s2369_s7 = inlined_call_operand.vmem [shape: f32[1,32], index: 7, kind: input, shape index: {}]   ;;  %s2370_s8 = inlined_call_operand.hbm [shape: f32[32,32], index: 8, kind: input, shape index: {}]   ;;  %s2371_s9 = inlined_call_operand.vmem [shape: f32[1,32], index: 9, kind: input, shape index: {}]   ;;  %s2372_s10 = inlined_call_operand.hbm [shape: f32[4,8,32], index: 10, kind: output, shape index: {}]  }
   0x1   :  { %16 = vsyncpa [#allocation7], 0 }
   0x2   :  { %17 = vsyncpa [#allocation10], 0 }
   0x3   :  { %18 = vsyncpa [#allocation5], 0 }
   0x4   :  { %20 = vsyncpa [#allocation5 + $0x1], 0  ;;  %s2092_s13 = smov 0   ;;  %s2094_s14 = smov 0  }
   0x5   :  { %s2096_s15 = smov 0   ;;  %s2098_s16 = smov 0  }
   0x6 LB: > { %s2113_s17 = sadd.s32 4294967295, %s2019_s16   ;;  %s1576_s18 = sadd.s32 4294967294, %s2019_s16   ;;  %s2019_s16 = sphi %s2098_s16, %s2382_s16   ;;  %s2015_s15 = sphi %s2096_s15, %s2381_s15   ;;  %s2011_s14 = sphi %s2094_s14, %s2380_s14   ;;  %s2007_s13 = sphi %s2092_s13, %s2379_s13  }
   0x7   : > { %s2117_s19 = sadd.s32 1, %s2019_s16   ;;  %s253_s20 = sadd.s32 1, %s2015_s15 }
   0x8   : > { %s250_s21 = ssub.s32 %s2019_s16, %s2117_s19  ;;  %p263_p0 = scmp.ne.s32.totalorder %s2015_s15, %s2011_s14 }
   0x9   : > { %p251_p1 = scmp.eq.s32.totalorder %s250_s21, 0  ;;  %p264_p2 = scmp.eq.s32.totalorder %s2113_s17, 3 }
   0xa   : > { %p269_p3 = scmp.ne.s32.totalorder %s2011_s14, %s2007_s13  ;;  %p270_p4 = scmp.eq.s32.totalorder %s1576_s18, 3 }
   0xb   : > { %s2128_s22 = scalar_select %p251_p1, %s2015_s15, %s253_s20  }
   0xc   : > { %p2130_p5 = por %p264_p2, %p263_p0  ;;  %p2134_p6 = por %p270_p4, %p269_p3 }
   0xd   : > { %2373 = sst [smem:[#allocation16_spill]] %s2128_s22  ;;  %p1577_p7 = scmp.ge.s32.totalorder %s2019_s16, 1 }
   0xe   : > { %p277_p8 = scmp.lt.s32.totalorder %s2019_s16, 5  ;;  %p1770_p9 = scmp.eq.s32.totalorder %s2113_s17, 0 }
   0xf   : > { %s2021_s26 = smov [#allocation6]   ;;  %s2022_s29 = smov [#allocation3]  }
  0x10   : > { %p2141_p10 = pnand %p1577_p7, %p277_p8  ;;  %s305_s27 = sshll.u32 %s2021_s26, 4  ;;  %s306_s27 = int_to_ptr.vmem [resolvable:$true] %s305_s27 }
  0x11   : > { %s289_s30 = sshll.u32 %s2022_s29, 4  ;;  %s2023_s11 = smov [#allocation8]   ;;  %s290_s30 = int_to_ptr.vmem [resolvable:$true] %s289_s30 }
  0x12   : > { %p1753_p11 = pneg %p2141_p10  ;;  %s321_s12 = sshll.u32 %s2023_s11, 4  ;;  %s322_s12 = int_to_ptr.vmem [resolvable:$true] %s321_s12 }
  0x13   : > { %s1854_s18 = scalar_lea.vmem %s306_s27, 512  ;;  %p1862_p3 = scmp.lt.s32.totalorder %s306_s27, %s306_s27 }
  0x14   : > { %p2149_p12 = pnand %p1770_p9, %p1753_p11  ;;  %p1855_p0 = scmp.ne.s32.totalorder %s306_s27, %s1854_s18 }
  0x15   : > { %p1863_p4 = scmp.lt.s32.totalorder %s1854_s18, %s1854_s18 }
  0x16   : > { %p1845_p13 = pneg %p2149_p12 }
  0x17   : > { %p1864_p7 = por %p1863_p4, %p1862_p3 }
  0x18   : > { %p1857_p1 = pnand %p1855_p0, %p1845_p13 }
  0x1a   : > { %p1858_p2 = pneg %p1857_p1 }
  0x1c   : > { %p1865_p8 = pnand %p1864_p7, %p1858_p2 }
  0x1e   : > { %1868 = shalt.err (!%p1865_p8)
}
  0x1f   : > { %s2024_s20 = smov 128   ;;  %s2025_s21 = smov 8  }
  0x20   : > { %1759 = dma.hbm_to_vmem [thread:$0]  (!%p2149_p12), %s2366_s4, 512, %s306_s27, [#allocation7], %s2024_s20, %s2024_s20, %s2025_s21  }
  0x21   : > { %s1880_s11 = scalar_lea.vmem %s290_s30, 512  ;;  %p1888_p2 = scmp.lt.s32.totalorder %s290_s30, %s290_s30 }
  0x22   : > { %p1881_p11 = scmp.ne.s32.totalorder %s290_s30, %s1880_s11  ;;  %p1889_p3 = scmp.lt.s32.totalorder %s1880_s11, %s1880_s11 }
  0x24   : > { %p1883_p0 = pnand %p1881_p11, %p1845_p13  ;;  %p1890_p4 = por %p1889_p3, %p1888_p2 }
  0x26   : > { %p1884_p1 = pneg %p1883_p0 }
  0x28   : > { %p1891_p7 = pnand %p1890_p4, %p1884_p1 }
  0x2a   : > { %1894 = shalt.err (!%p1891_p7)
}
  0x2b   : > { %1756 = dma.hbm_to_vmem [thread:$0]  (!%p2149_p12), %s2364_s2, 512, %s290_s30, [#allocation4], %s2024_s20, %s2024_s20, %s2025_s21  }
  0x2c   : > { %s1906_s27 = scalar_lea.vmem %s322_s12, 512  ;;  %p1914_p2 = scmp.lt.s32.totalorder %s322_s12, %s322_s12 }
  0x2d   : > { %p1907_p8 = scmp.ne.s32.totalorder %s322_s12, %s1906_s27  ;;  %p1915_p1 = scmp.lt.s32.totalorder %s1906_s27, %s1906_s27 }
  0x2f   : > { %p1909_p11 = pnand %p1907_p8, %p1845_p13  ;;  %p1916_p3 = por %p1915_p1, %p1914_p2 }
  0x31   : > { %p1910_p0 = pneg %p1909_p11 }
  0x33   : > { %p1917_p4 = pnand %p1916_p3, %p1910_p0 }
  0x35   : > { %1920 = shalt.err (!%p1917_p4)
}
  0x36   : > { %1762 = dma.hbm_to_vmem [thread:$0]  (!%p2149_p12), %s2368_s6, 512, %s322_s12, [#allocation7], %s2024_s20, %s2024_s20, %s2025_s21  }
  0x37   : > { %s2026_s30 = smov [#allocation9]  }
  0x38   : > { %s337_s29 = sshll.u32 %s2026_s30, 4  ;;  %s338_s29 = int_to_ptr.vmem [resolvable:$true] %s337_s29 }
  0x39   : > { %s1932_s11 = scalar_lea.vmem %s338_s29, 512  ;;  %p1940_p0 = scmp.lt.s32.totalorder %s338_s29, %s338_s29 }
  0x3a   : > { %p1933_p7 = scmp.ne.s32.totalorder %s338_s29, %s1932_s11  ;;  %p1941_p2 = scmp.lt.s32.totalorder %s1932_s11, %s1932_s11 }
  0x3c   : > { %p1935_p8 = pnand %p1933_p7, %p1845_p13  ;;  %p1942_p1 = por %p1941_p2, %p1940_p0 }
  0x3e   : > { %p1936_p11 = pneg %p1935_p8 }
  0x40   : > { %p1943_p3 = pnand %p1942_p1, %p1936_p11 }
  0x42   : > { %1946 = shalt.err (!%p1943_p3)
}
  0x43   : > { %1765 = dma.hbm_to_vmem [thread:$0]  (!%p2149_p12), %s2370_s8, 512, %s338_s29, [#allocation10], %s2024_s20, %s2024_s20, %s2025_s21  }
  0x44   : > { %370 = sbr.rel (%p2141_p10) target bundleno = 1890 (0x762), region = 60 }
  0x49   : > { %1990 = dma.done.wait (%p1770_p9), [#allocation4], 512  }
  0x4a   : > { %1992 = vsyncadd (%p1770_p9), [#allocation4], 4294966784 }
  0x4b   : > { %1994 = dma.done.wait (%p1770_p9), [#allocation7], 1024  }
  0x4c   : > { %1996 = vsyncadd (%p1770_p9), [#allocation7], 4294966272 }
  0x4d   : > { %1998 = dma.done.wait (%p1770_p9), [#allocation10], 512  }
  0x4e   : > { %2000 = vsyncadd (%p1770_p9), [#allocation10], 4294966784  ;;  %p423_p10 = scmp.lt.s32.totalorder %s2113_s17, 3  ;;  %v2027_v0 = vmov 0.0   ;;  %vm2028_vm0 = vmmov 0   ;;  %v2029_v1 = vmov 0  }
  0x4f   : > { %1651 = vmatprep.subr.mxu0 %v2027_v0  ;;  %1662 = vmatprep.subr.mxu1 %v2027_v0  ;;  %v435_v2 = vld [vmem:[#allocation3 + $0x18] sm:$0xff]  ;;  %v434_v4 = vld [vmem:[#allocation3 + $0x10] sm:$0xff]  ;;  %v433_v6 = vld [vmem:[#allocation3 + $0x8] sm:$0xff]  ;;  %vm443_vm2 = vcmask 261120   ;;  %vm688_vm3 = vcmask 64512   ;;  %s2032_s20 = smov 104  }
  0x50   : > { %1659 = vmatprep.mubr.msk.f32.mxu0 %vm2028_vm0, %v2027_v0  ;;  %1670 = vmatprep.mubr.msk.f32.mxu1 %vm2028_vm0, %v2027_v0  ;;  %s424_s25 = scalar_select %p423_p10, %s2113_s17, 3  ;;  %v520_v3 = vld [vmem:[#allocation6 + $0x18] sm:$0xff]  ;;  %v519_v5 = vld [vmem:[#allocation6 + $0x10] sm:$0xff]  ;;  %v518_v7 = vld [vmem:[#allocation6 + $0x8] sm:$0xff]  ;;  %vm1020_vm5 = vcmask 130112   ;;  %vm1191_vm6 = vcmask 195712  }
  0x51   : > { %1826 = vset.pattern.permute.xlu0 %v2029_v1  ;;  %1652 = vmatpush3.msra.mxu0 %v435_v2  ;;  %v432_v9 = vld [vmem:[#allocation3] sm:$0xff]  ;;  %v601_v13 = vld [vmem:[#allocation8 + $0x18] sm:$0xff]  ;;  %v600_v14 = vld [vmem:[#allocation8 + $0x10] sm:$0xff]  ;;  %s2033_s22 = smov 8   ;;  %s2034_s26 = smov 16   ;;  %vm1362_vm7 = vcmask 261312  }
  0x52   : > { %s1589_s28 = sshll.u32 %s424_s25, 3  ;;  %1663 = vmatpush3.msra.mxu1 %v520_v3  ;;  %1653 = vmatprep.subr.mxu0 %v2027_v0  ;;  %v517_v10 = vld [vmem:[#allocation6] sm:$0xff]  ;;  %v599_v15 = vld [vmem:[#allocation8 + $0x8] sm:$0xff]  ;;  %v1591_v17 = vld [vmem:[%s2365_s3] ss:$0 sm:$0xff]  ;;  %s2030_s25 = smov 120  }
  0x53   : > { %s430_s27 = scalar_lea.vmem %s2363_s1, %s1589_s28  ;;  %1664 = vmatprep.subr.mxu1 %v2027_v0  ;;  %s426_s30 = scalar_lea.vmem %s2362_s0, %s1589_s28  ;;  %1654 = vmatpush3.msra.mxu0 %v434_v4  ;;  %v598_v16 = vld [vmem:[#allocation8] sm:$0xff]  ;;  %v1593_v18 = vld [vmem:[%s2367_s5] ss:$0 sm:$0xff] }
  0x54   : > { %1665 = vmatpush3.msra.mxu1 %v519_v5  ;;  %v679_v8 = vld [vmem:[%s430_s27] sm:$0xff]  ;;  %1655 = vmatprep.subr.mxu0 %v2027_v0  ;;  %s2031_s28 = smov 112   ;;  %s420_s29 = sand.u32 1, %s2011_s14  }
  0x55   : > { %1666 = vmatprep.subr.mxu1 %v2027_v0  ;;  %vm680_vm1 = vcmp.ne.f32.partialorder %v679_v8, 0.0  ;;  %1656 = vmatpush3.msra.mxu0 %v433_v6  ;;  %v431_v11 = vld [vmem:[%s426_s30] sm:$0xff]  ;;  %s2035_s30 = smov 24   ;;  %s1588_s11 = sshll.u32 %s420_s29, 3 }
  0x56   : > { %1667 = vmatpush3.msra.mxu1 %v518_v7  ;;  %1657 = vmatprep.subr.mxu0 %v2027_v0  ;;  %v682_v12 = vsel %vm680_vm1, 1, %v2029_v1  ;;  %v1595_v39 = vld [vmem:[%s2369_s7] ss:$0 sm:$0xff] }
  0x57   : > { %1668 = vmatprep.subr.mxu1 %v2027_v0  ;;  %1658 = vmatpush3.msra.mxu0 %v432_v9 }
  0x58   : > { %1669 = vmatpush3.msra.mxu1 %v517_v10  ;;  %1660 = vmatmul.mubr.msk.f32.vlgmr.msra.gmra.mxu0 %vm443_vm2, %v431_v11 }
  0x59   : > { %1671 = vmatmul.mubr.msk.f32.vlgmr.msra.gmra.mxu1 %vm443_vm2, %v431_v11  ;;  %684 = vperm.xlu0 %1826, %v682_v12  }
  0x5a   : > { %1684 = vmatprep.subr.mxu1 %v2027_v0  ;;  %1686 = vmatprep.mubr.msk.f32.mxu1 %vm2028_vm0, %v2027_v0 }
  0x5b   : > { %1673 = vmatprep.subr.mxu0 %v2027_v0  ;;  %1681 = vmatprep.mubr.msk.f32.mxu0 %vm2028_vm0, %v2027_v0 }
  0x5c   : > { %1674 = vmatpush3.msra.mxu0 %v601_v13 }
  0x5d   : > { %1675 = vmatprep.subr.mxu0 %v2027_v0 }
  0x5e   : > { %1676 = vmatpush3.msra.mxu0 %v600_v14 }
  0x5f   : > { %1677 = vmatprep.subr.mxu0 %v2027_v0 }
  0x60   : > { %1678 = vmatpush3.msra.mxu0 %v599_v15 }
  0x61   : > { %1679 = vmatprep.subr.mxu0 %v2027_v0 }
  0x62   : > { %1680 = vmatpush3.msra.mxu0 %v598_v16 }
  0x63   : > { %1704 = vmatprep.subr.mxu0 %v2027_v0  ;;  %1682 = vmatmul.mubr.msk.f32.vlgmr.msra.gmra.mxu0 %vm443_vm2, %v431_v11 }
  0x64   : > { %1706 = vmatprep.mubr.msk.f32.mxu0 %vm2028_vm0, %v2027_v0 }
  0xd4   : > { %v685_v19 = vpop.permute.xlu0 %684 }
  0xd5   : > { %vm686_vm4 = vcmp.eq.s32.totalorder %v685_v19, 1 }
 0x118   : > { %v513_v20 = vpop.f32.mrf.mxu0 }
 0x119   : > { %v594_v21 = vpop.f32.mrf.mxu1  ;;  %v514_v22 = vadd.f32 %v1591_v17, %v513_v20 }
 0x11a   : > { %v595_v23 = vadd.f32 %v1593_v18, %v594_v21  ;;  %v1661_v24 = vpop.f32.mrf.mxu0 }
 0x11b   : > { %v1672_v25 = vpop.f32.mrf.mxu1  ;;  %v681_v26 = vmul.f32 0.35355338, %v514_v22  ;;  %v1368_v24 = vld [vmem:[#allocation9 + $0x18] sm:$0xff] }
 0x11c   : > { %852 = vrot.lane.b32.xlu1 %v595_v23, %s2030_s25  ;;  %1685 = vmatpush3.xpose.msk.msra.mxu1 %vm688_vm3, %v595_v23  ;;  %v1367_v25 = vld [vmem:[#allocation9 + $0x10] sm:$0xff] }
 0x11d   : > { %1689 = vmatprep.subr.mxu1 %v2027_v0  ;;  %v687_v27 = vsel %vm686_vm4, %v681_v26, 0.0  ;;  %v1366_v26 = vld [vmem:[#allocation9 + $0x8] sm:$0xff] }
 0x11f   : > { %1687 = vmatmul.mubr.msk.f32.vlgmr.msra.gmra.mxu1 %vm688_vm3, %v687_v27 }
 0x120   : > { %850 = vrot.lane.b32.xlu1 %v687_v27, %s2030_s25  ;;  %1691 = vmatprep.mubr.msk.f32.mxu1 %vm2028_vm0, %v2027_v0 }
 0x123   : > { %v675_v40 = vpop.f32.mrf.mxu0 }
 0x124   : > { %1024 = vrot.lane.b32.xlu1 %v595_v23, %s2031_s28  ;;  %v2271_v41 = vadd.f32 %v1595_v39, %v675_v40 }
 0x125   : > { %v1683_v42 = vpop.f32.mrf.mxu0 }
 0x126   : > { %1690 = vmatpush3.msra.mxu1 %v2271_v41 }
 0x127   : > { %1694 = vmatprep.subr.mxu1 %v2027_v0 }
 0x18e   : > { %v853_v28 = vpop.permute.xlu1 %852 }
 0x192   : > { %v851_v29 = vpop.permute.xlu1 %850 }
 0x196   : > { %v1025_v30 = vpop.permute.xlu1 %1024 }
 0x197   : > { %1705 = vmatpush3.xpose.msk.msra.mxu0 %vm688_vm3, %v1025_v30 }
 0x198   : > { %1714 = vmatprep.subr.mxu0 %v2027_v0 }
 0x1df   : > { %v761_v31 = vpop.f32.mrf.mxu1 }
 0x1e0   : > { %v765_v32 = vsel %vm688_vm3, %v761_v31, -inf }
 0x1e1   : > { %766 = vmax.xlane.f32.xlu0 %v765_v32  ;;  %v1688_v33 = vpop.f32.mrf.mxu1 }
 0x1f7   : > { %1193 = vrot.lane.b32.xlu0 %v687_v27, %s2032_s20 }
 0x26a   : > { %v767_v34 = vpop.xlane.xlu0 %766 }
 0x26b   : > { %v768_v35 = vsub.f32 %v761_v31, %v767_v34 }
 0x26d   : > { %v769_v36 = vmul.f32 1.442695, %v768_v35 }
 0x26e   : > { %v1194_v46 = vpop.permute.xlu0 %1193 }
 0x26f   : > { %1827 = vpow2.f32 %v769_v36 }
 0x27c   : > { %v1828_v37 = vpop.eup %1827 }
 0x27d   : > { %v771_v38 = vsel %vm688_vm3, %v1828_v37, 0.0 }
 0x27e   : > { %772 = vadd.xlane.f32.xlu1 %v771_v38 }
 0x28f   : > { %1022 = vrot.lane.b32.xlu1 %v687_v27, %s2031_s28 }
 0x293   : > { %1195 = vrot.lane.b32.xlu1 %v595_v23, %s2032_s20 }
 0x307   : > { %v773_v43 = vpop.xlane.xlu1 %772 }
 0x308   : > { %1829 = vrcp.f32 %v773_v43 }
 0x30b   : > { %v1023_v44 = vpop.permute.xlu1 %1022 }
 0x30c   : > { %1707 = vmatmul.mubr.msk.f32.vlgmr.msra.gmra.mxu0 %vm688_vm3, %v1023_v44 }
 0x30d   : > { %1716 = vmatprep.mubr.msk.f32.mxu0 %vm2028_vm0, %v2027_v0 }
 0x30f   : > { %v1196_v45 = vpop.permute.xlu1 %1195 }
 0x310   : > { %1715 = vmatpush3.xpose.msk.msra.mxu0 %vm688_vm3, %v1196_v45 }
 0x311   : > { %1724 = vmatprep.subr.mxu0 %v2027_v0 }
 0x313   : > { %1717 = vmatmul.mubr.msk.f32.vlgmr.msra.gmra.mxu0 %vm688_vm3, %v1194_v46 }
 0x314   : > { %1732 = vmatprep.mubr.msk.f32.mxu0 %vm2028_vm0, %v2027_v0  ;;  %1725 = vmatpush3.msra.mxu0 %v1368_v24 }
 0x315   : > { %v1830_v47 = vpop.eup %1829  ;;  %1726 = vmatprep.subr.mxu0 %v2027_v0 }
 0x316   : > { %v775_v48 = vmul.f32 %v1830_v47, %v1828_v37  ;;  %1727 = vmatpush3.msra.mxu0 %v1367_v25  ;;  %v1609_v37 = vld [vmem:[%s2371_s9] ss:$0 sm:$0xff] }
 0x317   : > { %1728 = vmatprep.subr.mxu0 %v2027_v0 }
 0x318   : > { %1692 = vmatmul.mubr.msk.f32.vlgmr.msra.gmra.mxu1 %vm688_vm3, %v775_v48  ;;  %1729 = vmatpush3.msra.mxu0 %v1366_v26 }
 0x319   : > { %1695 = vmatpush3.xpose.msk.msra.mxu1 %vm688_vm3, %v853_v28  ;;  %1696 = vmatprep.mubr.msk.f32.mxu1 %vm2028_vm0, %v2027_v0  ;;  %v1365_v28 = vld [vmem:[#allocation9] sm:$0xff] }
 0x31a   : > { %1699 = vmatprep.subr.mxu1 %v2027_v0  ;;  %1730 = vmatprep.subr.mxu0 %v2027_v0 }
 0x31b   : > { %1731 = vmatpush3.msra.mxu0 %v1365_v28 }
 0x31c   : > { %1697 = vmatmul.mubr.msk.f32.vlgmr.msra.gmra.mxu1 %vm688_vm3, %v851_v29 }
 0x31d   : > { %1701 = vmatprep.mubr.msk.f32.mxu1 %vm2028_vm0, %v2027_v0 }
 0x3cc   : > { %v1096_v49 = vpop.f32.mrf.mxu0 }
 0x3cd   : > { %v1100_v50 = vsel %vm688_vm3, %v1096_v49, -inf }
 0x3ce   : > { %1101 = vmax.xlane.f32.xlu0 %v1100_v50  ;;  %v1708_v51 = vpop.f32.mrf.mxu0 }
 0x3d3   : > { %v1267_v52 = vpop.f32.mrf.mxu0 }
 0x3d4   : > { %v1271_v59 = vsel %vm688_vm3, %v1267_v52, -inf }
 0x3d5   : > { %v1718_v53 = vpop.f32.mrf.mxu0 }
 0x3d8   : > { %v845_v54 = vpop.f32.mrf.mxu1 }
 0x3d9   : > { %849 = vst.msk [vmem:[#allocation2] sm:$0xff] %vm688_vm3, %v845_v54 }
 0x3da   : > { %v1693_v55 = vpop.f32.mrf.mxu1 }
 0x3dc   : > { %v924_v56 = vpop.f32.mrf.mxu1 }
 0x3dd   : > { %v928_v57 = vsel %vm688_vm3, %v924_v56, -inf }
 0x3de   : > { %929 = vmax.xlane.f32.xlu1 %v928_v57  ;;  %v1698_v58 = vpop.f32.mrf.mxu1 }
 0x3e2   : > { %1272 = vmax.xlane.f32.xlu1 %v1271_v59 }
 0x3e4   : > { %940 = vrot.lane.b32.xlu0 %v2271_v41, %s2030_s25  ;;  %s1612_s25 = sshll.u32 %s2113_s17, 7  ;;  %s2036_s17 = smov [#allocation11]  }
 0x457   : > { %v1102_v60 = vpop.xlane.xlu0 %1101 }
 0x458   : > { %v1103_v61 = vsub.f32 %v1096_v49, %v1102_v60 }
 0x45a   : > { %v1104_v62 = vmul.f32 1.442695, %v1103_v61 }
 0x45b   : > { %v941_v63 = vpop.permute.xlu0 %940 }
 0x45c   : > { %1831 = vpow2.f32 %v1104_v62  ;;  %1700 = vmatpush3.msra.mxu1 %v941_v63 }
 0x45d   : > { %1709 = vmatprep.subr.mxu1 %v2027_v0 }
 0x467   : > { %v930_v1 = vpop.xlane.xlu1 %929 }
 0x468   : > { %v931_v9 = vsub.f32 %v924_v56, %v930_v1 }
 0x469   : > { %v1832_v2 = vpop.eup %1831 }
 0x46a   : > { %v1106_v3 = vsel %vm688_vm3, %v1832_v2, 0.0  ;;  %v932_v10 = vmul.f32 1.442695, %v931_v9 }
 0x46b   : > { %1107 = vadd.xlane.f32.xlu1 %v1106_v3  ;;  %v1273_v4 = vpop.xlane.xlu1 %1272 }
 0x46c   : > { %v1274_v5 = vsub.f32 %v1267_v52, %v1273_v4 }
 0x46e   : > { %v1275_v6 = vmul.f32 1.442695, %v1274_v5 }
 0x470   : > { %1833 = vpow2.f32 %v1275_v6 }
 0x471   : > { %1835 = vpow2.f32 %v932_v10 }
 0x47d   : > { %v1834_v7 = vpop.eup %1833 }
 0x47e   : > { %v1277_v8 = vsel %vm688_vm3, %v1834_v7, 0.0  ;;  %v1836_v11 = vpop.eup %1835 }
 0x47f   : > { %1278 = vadd.xlane.f32.xlu1 %v1277_v8  ;;  %v934_v12 = vsel %vm688_vm3, %v1836_v11, 0.0 }
 0x490   : > { %1111 = vrot.lane.b32.xlu1 %v2271_v41, %s2031_s28  ;;  %s422_s28 = scalar_lea.vmem [#allocation11], %s1588_s11  ;;  %s1951_s11 = sshll.u32 %s2036_s17, 4  ;;  %s1952_s11 = int_to_ptr.vmem [resolvable:$false] %s1951_s11 }
 0x491   : > { %s1953_s12 = scalar_lea.vmem %s1952_s11, 256 }
 0x4b4   : > { %935 = vadd.xlane.f32.xlu1 %v934_v12 }
 0x4c5   : > { %1282 = vrot.lane.b32.xlu1 %v2271_v41, %s2032_s20  ;;  %s1464_s20 = sshll.u32 %s422_s28, 4  ;;  %s1465_s20 = int_to_ptr.vmem [resolvable:$true] %s1464_s20 }
 0x4c6   : > { %p1954_p4 = scmp.lt.s32.totalorder %s1465_s20, %s1952_s11 }
 0x4f4   : > { %v1108_v13 = vpop.xlane.xlu1 %1107 }
 0x508   : > { %v1279_v14 = vpop.xlane.xlu1 %1278 }
 0x50c   : > { %v1112_v15 = vpop.permute.xlu1 %1111 }
 0x53d   : > { %v936_v16 = vpop.xlane.xlu1 %935 }
 0x53e   : > { %1837 = vrcp.f32 %v936_v16 }
 0x53f   : > { %1839 = vrcp.f32 %v1108_v13 }
 0x540   : > { %1841 = vrcp.f32 %v1279_v14 }
 0x541   : > { %v1283_v22 = vpop.permute.xlu1 %1282 }
 0x54b   : > { %v1838_v17 = vpop.eup %1837 }
 0x54c   : > { %v938_v18 = vmul.f32 %v1838_v17, %v1836_v11  ;;  %v1840_v19 = vpop.eup %1839 }
 0x54d   : > { %v1110_v20 = vmul.f32 %v1840_v19, %v1832_v2  ;;  %v1842_v21 = vpop.eup %1841 }
 0x54e   : > { %1702 = vmatmul.mubr.msk.f32.vlgmr.msra.gmra.mxu1 %vm688_vm3, %v938_v18  ;;  %v1281_v23 = vmul.f32 %v1842_v21, %v1834_v7 }
 0x54f   : > { %1710 = vmatpush3.msra.mxu1 %v1112_v15  ;;  %1711 = vmatprep.mubr.msk.f32.mxu1 %vm2028_vm0, %v2027_v0 }
 0x550   : > { %1719 = vmatprep.subr.mxu1 %v2027_v0 }
 0x552   : > { %1712 = vmatmul.mubr.msk.f32.vlgmr.msra.gmra.mxu1 %vm688_vm3, %v1110_v20 }
 0x553   : > { %1720 = vmatpush3.msra.mxu1 %v1283_v22  ;;  %1721 = vmatprep.mubr.msk.f32.mxu1 %vm2028_vm0, %v2027_v0 }
 0x556   : > { %1722 = vmatmul.mubr.msk.f32.vlgmr.msra.gmra.mxu1 %vm688_vm3, %v1281_v23 }
 0x60e   : > { %v1012_v27 = vpop.f32.mrf.mxu1 }
 0x60f   : > { %1017 = vrot.lane.b32.xlu0 %v1012_v27, %s2033_s22  ;;  %s2326_s22 = scalar_lea.hbm %s2372_s10, %s1612_s25 }
 0x610   : > { %v1703_v29 = vpop.f32.mrf.mxu1 }
 0x612   : > { %v1183_v30 = vpop.f32.mrf.mxu1 }
 0x613   : > { %1188 = vrot.lane.b32.xlu1 %v1183_v30, %s2034_s26  ;;  %s1451_s26 = scalar_lea.sflag [#allocation5], %s420_s29 }
 0x614   : > { %v1713_v31 = vpop.f32.mrf.mxu1 }
 0x616   : > { %v1354_v32 = vpop.f32.mrf.mxu1 }
 0x617   : > { %1359 = vrot.lane.b32.xlu0 %v1354_v32, %s2035_s30  ;;  %s1947_s30 = scalar_lea.vmem %s1465_s20, 128 }
 0x618   : > { %v1723_v33 = vpop.f32.mrf.mxu1  ;;  %p1948_p9 = scmp.ne.s32.totalorder %s1465_s20, %s1947_s30  ;;  %p1955_p7 = scmp.lt.s32.totalorder %s1953_s12, %s1947_s30 }
 0x61a   : > { %p1949_p12 = pnand %p1948_p9, %p2130_p5  ;;  %p1956_p8 = por %p1955_p7, %p1954_p4 }
 0x61c   : > { %p1950_p13 = pneg %p1949_p12 }
 0x61e   : > { %p1957_p11 = pnand %p1956_p8, %p1950_p13 }
 0x681   : > { %v1018_v34 = vpop.permute.xlu0 %1017 }
 0x682   : > { %1021 = vst.msk [vmem:[#allocation2] sm:$0xff] %vm1020_vm5, %v1018_v34 }
 0x685   : > { %v1189_v35 = vpop.permute.xlu1 %1188 }
 0x686   : > { %1192 = vst.msk [vmem:[#allocation2] sm:$0xff] %vm1191_vm6, %v1189_v35 }
 0x689   : > { %v1360_v36 = vpop.permute.xlu0 %1359 }
 0x68a   : > { %1363 = vst.msk [vmem:[#allocation2] sm:$0xff] %vm1362_vm7, %v1360_v36 }
 0x691   : > { %v1364_v0 = vld [vmem:[#allocation2] sm:$0xff] }
 0x692   : > { %1733 = vmatmul.mubr.msk.f32.vlgmr.msra.gmra.mxu0 %vm443_vm2, %v1364_v0 }
 0x752   : > { %v1445_v38 = vpop.f32.mrf.mxu0 }
 0x753   : > { %v1446_v39 = vadd.f32 %v1609_v37, %v1445_v38 }
 0x754   : > { %v1734_v40 = vpop.f32.mrf.mxu0 }
 0x755   : > { %1449 = vst.msk [vmem:[%s422_s28] sm:$0xff] %vm443_vm2, %v1446_v39 }
 0x756   : > { %1960 = shalt.err (!%p1957_p11)
}
 0x757   : > { %s1961_s18 = scalar_lea.hbm %s2326_s22, 128  ;;  %s1965_s28 = scalar_lea.hbm %s2372_s10, 512 }
 0x758   : > { %p1962_p0 = scmp.ne.s32.totalorder %s2326_s22, %s1961_s18  ;;  %p1966_p3 = scmp.lt.s32.totalorder %s2326_s22, %s2372_s10 }
 0x759   : > { %p1967_p10 = scmp.lt.s32.totalorder %s1965_s28, %s1961_s18 }
 0x75a   : > { %p1963_p2 = pnand %p1962_p0, %p2130_p5 }
 0x75b   : > { %p1968_p9 = por %p1967_p10, %p1966_p3 }
 0x75c   : > { %p1964_p1 = pneg %p1963_p2 }
 0x75e   : > { %p1969_p12 = pnand %p1968_p9, %p1964_p1 }
 0x760   : > { %1972 = shalt.err (!%p1969_p12)
}
 0x761   : > { %1751 = dma.vmem_to_hbm [thread:$0]  (%p2130_p5), %s1465_s20, 128, %s2326_s22, %s1451_s26  }
 0x762 PF: > { %p1778_p13 = scmp.ge.s32.totalorder %s2019_s16, 2  ;;  %s1476_s30 = sand.u32 1, %s2007_s13  }
 0x763   : > { %s1477_s17 = scalar_lea.sflag [#allocation5], %s1476_s30 }
 0x764   : > { %p1767_p4 = pnand %p1778_p13, %p2134_p6 }
 0x766   : > { %p1768_p7 = pneg %p1767_p4 }
 0x768   : > { %2002 = dma.done.wait (%p1768_p7), %s1477_s17, 128  }
 0x769   : > { %2004 = vsyncadd (%p1768_p7), %s1477_s17, 4294967168  ;;  %s2378_s11 = sld [smem:[#allocation16_spill]]  ;;  %p23_p8 = scmp.ge.s32.totalorder %s2117_s19, 6  }
 0x76a   : > { %s2379_s13 = smov %s2011_s14  ;;  %s2380_s14 = smov %s2015_s15 }
 0x76b   : > { %s2382_s16 = smov %s2117_s19  ;;  %25 = sbr.rel (!%p23_p8) target bundleno = 6 (0x6), region = 115 }
 0x76f   : > { %s2381_s15 = smov %s2378_s11 }
 0x770   :  { %1482 = vsyncpa [#allocation4], 1 }
 0x771   :  { %1484 = vsyncpa [#allocation4 + $0x1], 1 }
 0x772   :  { %1485 = vsyncpa [#allocation7], 1 }
 0x773   :  { %1486 = vsyncpa [#allocation10], 1 }
 0x774   :  { %1487 = vsyncpa [#allocation5], 1 }
 0x775   :  { %1489 = vsyncpa [#allocation5 + $0x1], 1 }

</bundles_post_ra>
